<compile_context>
chip_gen: v7x
topology: tpu7x:2x2x1
jax: 0.10.0
libtpu: 0.0.40
codegen_flags: <defaults>
</compile_context>

<pallas_src>
import math

import jax
import jax.numpy as jnp
from jax.experimental import pallas as pl
from jax.experimental.pallas import tpu as pltpu


def _round_up(x: int, n: int) -> int:
    return ((x + n - 1) // n) * n


def _fc_kernel(x_ref, w_ref, b_ref, o_ref, acc_ref):
    # x_ref: (TM, TK), w_ref: (TK, Np), b_ref: (1, Np),
    # o_ref: (TM, Np), acc_ref: (TM, Np) f32 scratch.
    k = pl.program_id(1)

    @pl.when(k == 0)
    def _():
        acc_ref[...] = jnp.zeros_like(acc_ref)

    acc_ref[...] += jnp.dot(
        x_ref[...], w_ref[...], preferred_element_type=jnp.float32
    )

    @pl.when(k == pl.num_programs(1) - 1)
    def _():
        y = acc_ref[...] + b_ref[...].astype(jnp.float32)
        # LeakyReLU with negative_slope=0.33 (matches PyTorch at y == 0).
        y = jnp.where(y >= 0, y, 0.33 * y)
        o_ref[...] = y.astype(o_ref.dtype)


def fc_forward(x, weight, bias, *, tm_max=512, tk_max=512):
    """x: (..., C_in); weight: (C_in, C_out); bias: (C_out,)."""
    orig_shape = x.shape
    c_in = orig_shape[-1]
    c_out = weight.shape[1]
    m = math.prod(orig_shape[:-1]) if len(orig_shape) > 1 else 1
    x2d = x.reshape(m, c_in)

    # --- tile sizes & padded extents (lane-dense, MXU-aligned) -------------
    tm = min(tm_max, _round_up(m, 8))          # M tile (multiple of 8 sublanes)
    m_p = _round_up(m, tm)
    c_in_p = _round_up(c_in, 128)              # K padded to 128 lanes
    tk = min(tk_max, c_in_p)                   # K tile
    c_in_p = _round_up(c_in_p, tk)             # ensure tk | c_in_p
    c_out_p = _round_up(c_out, 128)            # N padded to 128 lanes

    # --- zero-pad operands (zeros contribute nothing to the matmul) --------
    x_p = jnp.pad(x2d, ((0, m_p - m), (0, c_in_p - c_in)))
    w_p = jnp.pad(weight, ((0, c_in_p - c_in), (0, c_out_p - c_out)))
    b_p = jnp.pad(bias, (0, c_out_p - c_out)).reshape(1, c_out_p)

    grid = (m_p // tm, c_in_p // tk)
    itemsize = jnp.dtype(x.dtype).itemsize
    cost = pl.CostEstimate(
        flops=2 * m * c_in * c_out,
        transcendentals=0,
        bytes_accessed=(m * c_in + c_in * c_out + c_out + m * c_out) * itemsize,
    )

    out = pl.pallas_call(
        _fc_kernel,
        out_shape=jax.ShapeDtypeStruct((m_p, c_out_p), x.dtype),
        grid_spec=pltpu.PrefetchScalarGridSpec(
            num_scalar_prefetch=0,
            grid=grid,
            in_specs=[
                pl.BlockSpec((tm, tk), lambda i, k: (i, k)),        # activations
                pl.BlockSpec((tk, c_out_p), lambda i, k: (k, 0)),   # weight (resident per K block)
                pl.BlockSpec((1, c_out_p), lambda i, k: (0, 0)),    # bias (resident)
            ],
            out_specs=pl.BlockSpec((tm, c_out_p), lambda i, k: (i, 0)),
            scratch_shapes=[pltpu.VMEM((tm, c_out_p), jnp.float32)],
        ),
        compiler_params=pltpu.CompilerParams(
            dimension_semantics=("parallel", "arbitrary"),
            vmem_limit_bytes=64 * 1024 * 1024,
        ),
        cost_estimate=cost,
    )(x_p, w_p, b_p)

    # Slice off the M / C_out padding and restore the leading dims.
    out = out[:m, :c_out]
    return out.reshape(*orig_shape[:-1], c_out)


def _reference(x, weight, bias):
    y = jnp.einsum("...i,io->...o", x, weight) + bias
    return jnp.where(y >= 0, y, 0.33 * y)


if __name__ == "__main__":
    key = jax.random.PRNGKey(0)
    k_x, k_w, k_b = jax.random.split(key, 3)

    C_in, C_out = 32, 64
    batch, seq = 2, 8

    # Deterministic parameter init (mimics nn.Linear's uniform bound 1/sqrt(C_in)).
    bound = 1.0 / (C_in ** 0.5)
    weight = jax.random.uniform(k_w, (C_in, C_out), jnp.float32, -bound, bound)
    bias = jax.random.uniform(k_b, (C_out,), jnp.float32, -bound, bound)

    x = jax.random.normal(k_x, (batch, seq, C_in), jnp.float32)

    out = fc_forward(x, weight, bias)
    out = jax.block_until_ready(out)

    ref = _reference(x, weight, bias)
    assert out.shape == (batch, seq, C_out)
    assert jnp.allclose(out, ref, atol=1e-5, rtol=1e-5)

    print("KERNEL_OK")
</pallas_src>

<mosaic_0001>
module attributes {stable_mosaic.version = 11 : i64} {
  func.func @_fc_kernel(%arg0: i32, %arg1: i32, %arg2: memref<16x128xf32, #tpu.memory_space<vmem>>, %arg3: memref<128x128xf32, #tpu.memory_space<vmem>>, %arg4: memref<1x128xf32, #tpu.memory_space<vmem>>, %arg5: memref<16x128xf32, #tpu.memory_space<vmem>>, %arg6: memref<16x128xf32, #tpu.memory_space<vmem>>) attributes {dimension_semantics = [#tpu.dimension_semantics<parallel>, #tpu.dimension_semantics<arbitrary>], iteration_bounds = array<i64: 1, 1>, scalar_prefetch = 0 : i64, scratch_operands = 1 : i64, tpu.core_type = #tpu.core_type<tc>, window_params = [{transform_indices = @transform_0, window_bounds = array<i64: 16, 128>}, {transform_indices = @transform_1, window_bounds = array<i64: 128, 128>}, {pipeline_mode = #tpu.pipeline_mode<synchronous>, transform_indices = @transform_2, window_bounds = array<i64: 1, 128>}, {transform_indices = @transform_3, window_bounds = array<i64: 16, 128>}]} {
    %c0_i32 = arith.constant 0 : i32
    %0 = arith.cmpi eq, %arg1, %c0_i32 : i32
    %1 = arith.extui %0 : i1 to i32
    %c0_i32_0 = arith.constant 0 : i32
    %2 = arith.cmpi ne, %1, %c0_i32_0 : i32
    scf.if %2 {
      %cst_10 = arith.constant 0.000000e+00 : f32
      %12 = vector.broadcast %cst_10 : f32 to vector<16x128xf32>
      %c0_11 = arith.constant 0 : index
      %c0_12 = arith.constant 0 : index
      %13 = vector.load %arg6[%c0_11, %c0_12] : memref<16x128xf32, #tpu.memory_space<vmem>>, vector<16x128xf32>
      tpu.vector_store %arg6[%c0_11, %c0_12], %12 {strides = array<i32>} : memref<16x128xf32, #tpu.memory_space<vmem>>, vector<16x128xf32>,
    } else {
    }
    %c0 = arith.constant 0 : index
    %c0_1 = arith.constant 0 : index
    %3 = vector.load %arg6[%c0, %c0_1] : memref<16x128xf32, #tpu.memory_space<vmem>>, vector<16x128xf32>
    %c0_2 = arith.constant 0 : index
    %c0_3 = arith.constant 0 : index
    %4 = vector.load %arg2[%c0_2, %c0_3] : memref<16x128xf32, #tpu.memory_space<vmem>>, vector<16x128xf32>
    %c0_4 = arith.constant 0 : index
    %c0_5 = arith.constant 0 : index
    %5 = vector.load %arg3[%c0_4, %c0_5] : memref<128x128xf32, #tpu.memory_space<vmem>>, vector<128x128xf32>
    %cst = arith.constant dense<0.000000e+00> : vector<16x128xf32>
    %6 = tpu.matmul %4, %5, %cst {dimension_numbers = #tpu.dot_dimension_numbers<[1], [0], [0], [1], [0, 0, 1, 1], [], []>} : vector<16x128xf32>, vector<128x128xf32>, vector<16x128xf32> -> vector<16x128xf32>
    %7 = arith.addf %3, %6 : vector<16x128xf32>
    %c0_6 = arith.constant 0 : index
    %c0_7 = arith.constant 0 : index
    %8 = vector.load %arg6[%c0_6, %c0_7] : memref<16x128xf32, #tpu.memory_space<vmem>>, vector<16x128xf32>
    tpu.vector_store %arg6[%c0_6, %c0_7], %7 {strides = array<i32>} : memref<16x128xf32, #tpu.memory_space<vmem>>, vector<16x128xf32>,
    %c0_i32_8 = arith.constant 0 : i32
    %9 = arith.cmpi eq, %arg1, %c0_i32_8 : i32
    %10 = arith.extui %9 : i1 to i32
    %c0_i32_9 = arith.constant 0 : i32
    %11 = arith.cmpi ne, %10, %c0_i32_9 : i32
    scf.if %11 {
      %c0_10 = arith.constant 0 : index
      %c0_11 = arith.constant 0 : index
      %12 = vector.load %arg6[%c0_10, %c0_11] : memref<16x128xf32, #tpu.memory_space<vmem>>, vector<16x128xf32>
      %c0_12 = arith.constant 0 : index
      %c0_13 = arith.constant 0 : index
      %13 = vector.load %arg4[%c0_12, %c0_13] : memref<1x128xf32, #tpu.memory_space<vmem>>, vector<1x128xf32>
      %14 = vector.broadcast %13 : vector<1x128xf32> to vector<16x128xf32>
      %15 = arith.addf %12, %14 : vector<16x128xf32>
      %cst_14 = arith.constant 0.000000e+00 : f32
      %16 = vector.broadcast %cst_14 : f32 to vector<16x128xf32>
      %17 = arith.cmpf oge, %15, %16 : vector<16x128xf32>
      %cst_15 = arith.constant 3.300000e-01 : f32
      %18 = vector.broadcast %cst_15 : f32 to vector<16x128xf32>
      %19 = arith.mulf %18, %15 : vector<16x128xf32>
      %20 = arith.select %17, %15, %19 : vector<16x128xi1>, vector<16x128xf32>
      %c0_16 = arith.constant 0 : index
      %c0_17 = arith.constant 0 : index
      %21 = vector.load %arg5[%c0_16, %c0_17] : memref<16x128xf32, #tpu.memory_space<vmem>>, vector<16x128xf32>
      tpu.vector_store %arg5[%c0_16, %c0_17], %20 {strides = array<i32>} : memref<16x128xf32, #tpu.memory_space<vmem>>, vector<16x128xf32>,
    } else {
    }
    return
  }
  func.func @transform_0(%arg0: i32, %arg1: i32) -> (i32, i32) {
    %c0_i32 = arith.constant 0 : i32
    return %arg0, %arg1 : i32, i32
  }
  func.func @transform_1(%arg0: i32, %arg1: i32) -> (i32, i32) {
    %c0_i32 = arith.constant 0 : i32
    %c0_i32_0 = arith.constant 0 : i32
    return %arg1, %c0_i32 : i32, i32
  }
  func.func @transform_2(%arg0: i32, %arg1: i32) -> (i32, i32) {
    %c0_i32 = arith.constant 0 : i32
    %c0_i32_0 = arith.constant 0 : i32
    %c0_i32_1 = arith.constant 0 : i32
    return %c0_i32, %c0_i32_0 : i32, i32
  }
  func.func @transform_3(%arg0: i32, %arg1: i32) -> (i32, i32) {
    %c0_i32 = arith.constant 0 : i32
    %c0_i32_0 = arith.constant 0 : i32
    return %arg0, %c0_i32 : i32, i32
  }
}

</mosaic_0001>

<bundles_post_ra>
// kernel: tpu_custom_call.1
= control target key start
LH: loop header
LB: loop body
LE: loop exit
PB: predicated region body
PF: predicated region fallthrough
CT: control target
= control target key end

     0   :  { %8 = vsyncpa [#allocation4], 0  ;;  %s475_s0 = inlined_call_operand.hbm [shape: f32[16,128], index: 0, kind: input, shape index: {}]   ;;  %s476_s1 = inlined_call_operand.hbm [shape: f32[128,128], index: 1, kind: input, shape index: {}]   ;;  %s477_s2 = inlined_call_operand.hbm [shape: f32[1,128], index: 2, kind: input, shape index: {}]   ;;  %s478_s3 = inlined_call_operand.hbm [shape: f32[16,128], index: 3, kind: output, shape index: {}]  }
   0x1   :  { %9 = vsyncpa [#allocation7], 0 }
   0x2   :  { %10 = vsyncpa [#allocation5], 0  ;;  %s385_s12 = smov [#allocation6]   ;;  %s386_s14 = smov [#allocation3]  }
   0x3   :  { %s28_s13 = sshll.u32 %s385_s12, 4  ;;  %s16_s15 = sshll.u32 %s386_s14, 4  ;;  %s29_s13 = int_to_ptr.vmem [resolvable:$true] %s28_s13  ;;  %s411_s15 = int_to_ptr.vmem [resolvable:$true] %s16_s15 }
   0x4   :  { %s291_s18 = scalar_lea.hbm %s476_s1, 2048 }
   0x5   :  { %p292_p0 = scmp.ne.s32.totalorder %s476_s1, %s291_s18  ;;  %p295_p1 = scmp.lt.u32.totalorder %s291_s18, %s476_s1 }
   0x7   :  { %p297_p2 = pnand %p295_p1, %p292_p0 }
   0x9   :  { %300 = shalt.err (!%p297_p2)
}
   0xa   :  { %s301_s23 = scalar_lea.vmem %s29_s13, 2048  ;;  %p306_p4 = scmp.lt.s32.totalorder %s29_s13, %s29_s13 }
   0xb   :  { %p302_p3 = scmp.ne.s32.totalorder %s29_s13, %s301_s23  ;;  %p307_p5 = scmp.lt.s32.totalorder %s301_s23, %s301_s23 }
   0xd   :  { %p308_p6 = por %p307_p5, %p306_p4 }
   0xf   :  { %p309_p7 = pnand %p308_p6, %p302_p3 }
  0x11   :  { %312 = shalt.err (!%p309_p7)
}
  0x12   :  { %s387_s24 = smov 128   ;;  %s388_s25 = smov 8  }
  0x13   :  { %34 = dma.hbm_to_vmem [thread:$0]  %s476_s1, 2048, %s29_s13, [#allocation7], %s387_s24, %s387_s24, %s388_s25  }
  0x14   :  { %s313_s30 = scalar_lea.hbm %s475_s0, 256 }
  0x15   :  { %p314_p8 = scmp.ne.s32.totalorder %s475_s0, %s313_s30  ;;  %p317_p9 = scmp.lt.u32.totalorder %s313_s30, %s475_s0 }
  0x17   :  { %p319_p10 = pnand %p317_p9, %p314_p8 }
  0x19   :  { %322 = shalt.err (!%p319_p10)
}
  0x1a   :  { %s323_s8 = scalar_lea.vmem %s411_s15, 256  ;;  %p328_p12 = scmp.lt.s32.totalorder %s411_s15, %s411_s15 }
  0x1b   :  { %p324_p11 = scmp.ne.s32.totalorder %s411_s15, %s323_s8  ;;  %p329_p13 = scmp.lt.s32.totalorder %s323_s8, %s323_s8 }
  0x1d   :  { %p330_p0 = por %p329_p13, %p328_p12 }
  0x1f   :  { %p331_p1 = pnand %p330_p0, %p324_p11 }
  0x21   :  { %334 = shalt.err (!%p331_p1)
}
  0x22   :  { %22 = dma.hbm_to_vmem [thread:$0]  %s475_s0, 256, %s411_s15, [#allocation4], %s387_s24, %s387_s24, %s388_s25  }
  0x23   :  { %s389_s10 = smov [#allocation8]   ;;  %s335_s14 = scalar_lea.hbm %s477_s2, 16 }
  0x24   :  { %s41_s11 = sshll.u32 %s389_s10, 4  ;;  %p336_p2 = scmp.ne.s32.totalorder %s477_s2, %s335_s14  ;;  %s42_s11 = int_to_ptr.vmem [resolvable:$true] %s41_s11 }
  0x25   :  { %p339_p3 = scmp.lt.u32.totalorder %s335_s14, %s477_s2 }
  0x27   :  { %p341_p4 = pnand %p339_p3, %p336_p2 }
  0x29   :  { %344 = shalt.err (!%p341_p4)
}
  0x2a   :  { %s345_s20 = scalar_lea.vmem %s42_s11, 16  ;;  %s349_s0 = scalar_lea.vmem %s42_s11, 32 }
  0x2b   :  { %p346_p5 = scmp.ne.s32.totalorder %s42_s11, %s345_s20  ;;  %p350_p6 = scmp.lt.s32.totalorder %s42_s11, %s42_s11 }
  0x2c   :  { %p351_p7 = scmp.lt.s32.totalorder %s349_s0, %s345_s20 }
  0x2e   :  { %p352_p8 = por %p351_p7, %p350_p6 }
  0x30   :  { %p353_p9 = pnand %p352_p8, %p346_p5 }
  0x32   :  { %356 = shalt.err (!%p353_p9)
}
  0x33   :  { %44 = dma.hbm_to_vmem [thread:$0]  %s477_s2, 16, %s42_s11, [#allocation7]  }
  0x34   :  { %379 = dma.done.wait [#allocation4], 256  }
  0x35   :  { %380 = vsyncadd [#allocation4], 4294967040 }
  0x36   :  { %381 = dma.done.wait [#allocation7], 2064  }
  0x37   :  { %382 = vsyncadd [#allocation7], 4294965232  ;;  %v64_v0 = vld [vmem:[#allocation6] sm:$0xff]  ;;  %v65_v1 = vld [vmem:[#allocation6 + $0x8] sm:$0xff]  ;;  %s390_s2 = smov [#allocation9]  }
  0x38   :  { %v66_v2 = vld [vmem:[#allocation6 + $0x10] sm:$0xff]  ;;  %v253_v3 = vpack.c.bf16 %v65_v1, %v64_v0  ;;  %v67_v4 = vld [vmem:[#allocation6 + $0x18] sm:$0xff]  ;;  %v68_v6 = vld [vmem:[#allocation6 + $0x20] sm:$0xff]  ;;  %s186_s22 = sshll.u32 %s390_s2, 4  ;;  %s187_s22 = int_to_ptr.vmem [resolvable:$true] %s186_s22 }
  0x39   :  { %v257_v5 = vpack.c.bf16 %v67_v4, %v66_v2  ;;  %v69_v7 = vld [vmem:[#allocation6 + $0x28] sm:$0xff]  ;;  %v62_v9 = vld [vmem:[#allocation3] sm:$0xff]  ;;  %v71_v11 = vld [vmem:[#allocation6 + $0x38] sm:$0xff]  ;;  %s357_s23 = scalar_lea.vmem %s187_s22, 256  ;;  %p362_p11 = scmp.lt.s32.totalorder %s187_s22, %s187_s22 }
  0x3a   :  { %254 = vmatprep.subr.bf16.mxu0 %v253_v3  ;;  %v261_v8 = vpack.c.bf16 %v69_v7, %v68_v6  ;;  %v70_v10 = vld [vmem:[#allocation6 + $0x30] sm:$0xff]  ;;  %250 = vmatprep.mubr.f32.mxu0 %v62_v9  ;;  %v72_v13 = vld [vmem:[#allocation6 + $0x40] sm:$0xff]  ;;  %v73_v14 = vld [vmem:[#allocation6 + $0x48] sm:$0xff]  ;;  %p358_p10 = scmp.ne.s32.totalorder %s187_s22, %s357_s23  ;;  %p363_p12 = scmp.lt.s32.totalorder %s357_s23, %s357_s23 }
  0x3b   :  { %256 = vmatpush3.bf16.msra.mxu0 %v253_v3  ;;  %v265_v12 = vpack.c.bf16 %v71_v11, %v70_v10  ;;  %v269_v15 = vpack.c.bf16 %v73_v14, %v72_v13  ;;  %v74_v16 = vld [vmem:[#allocation6 + $0x50] sm:$0xff]  ;;  %v75_v17 = vld [vmem:[#allocation6 + $0x58] sm:$0xff]  ;;  %v76_v19 = vld [vmem:[#allocation6 + $0x60] sm:$0xff] }
  0x3c   :  { %258 = vmatprep.subr.bf16.mxu0 %v257_v5  ;;  %v273_v18 = vpack.c.bf16 %v75_v17, %v74_v16  ;;  %v77_v20 = vld [vmem:[#allocation6 + $0x68] sm:$0xff]  ;;  %v78_v22 = vld [vmem:[#allocation6 + $0x70] sm:$0xff]  ;;  %v79_v23 = vld [vmem:[#allocation6 + $0x78] sm:$0xff]  ;;  %p364_p13 = por %p363_p12, %p362_p11 }
  0x3d   :  { %v277_v21 = vpack.c.bf16 %v77_v20, %v76_v19  ;;  %v281_v24 = vpack.c.bf16 %v79_v23, %v78_v22  ;;  %v63_v25 = vld [vmem:[#allocation3 + $0x8] sm:$0xff]  ;;  %v199_v26 = vld [vmem:[#allocation8] ss:$0 sm:$0xff] }
  0x3e   :  { %p365_p0 = pnand %p364_p13, %p358_p10 }
  0x3f   :  { %260 = vmatpush3.bf16.msra.mxu0 %v257_v5 }
  0x40   :  { %262 = vmatprep.subr.bf16.mxu0 %v261_v8 }
  0x43   :  { %264 = vmatpush3.bf16.msra.mxu0 %v261_v8 }
  0x44   :  { %266 = vmatprep.subr.bf16.mxu0 %v265_v12 }
  0x47   :  { %268 = vmatpush3.bf16.msra.mxu0 %v265_v12 }
  0x48   :  { %270 = vmatprep.subr.bf16.mxu0 %v269_v15 }
  0x4b   :  { %272 = vmatpush3.bf16.msra.mxu0 %v269_v15 }
  0x4c   :  { %274 = vmatprep.subr.bf16.mxu0 %v273_v18 }
  0x4f   :  { %276 = vmatpush3.bf16.msra.mxu0 %v273_v18 }
  0x50   :  { %278 = vmatprep.subr.bf16.mxu0 %v277_v21 }
  0x53   :  { %280 = vmatpush3.bf16.msra.mxu0 %v277_v21 }
  0x54   :  { %282 = vmatprep.subr.bf16.mxu0 %v281_v24 }
  0x57   :  { %284 = vmatpush3.bf16.msra.mxu0 %v281_v24 }
  0x5a   :  { %251 = vmatmul.mubr.f32.vlgmr.msra.gmra.mrb[0].mxu0 %v63_v25 }
 0x12d   :  { %v252_v27 = vpop.f32.mrb[0].mxu0 }
 0x12e   :  { %v172_v28 = vadd.f32 %v252_v27, %v199_v26  ;;  %v146_v29 = vpop.f32.mrb[1].mxu0 }
 0x12f   :  { %v171_v30 = vadd.f32 %v199_v26, %v146_v29 }
 0x130   :  { %vm174_vm0 = vcmp.ge.f32.partialorder %v172_v28, 0.0  ;;  %v176_v31 = vmul.f32 0.33, %v172_v28 }
 0x131   :  { %vm173_vm1 = vcmp.ge.f32.partialorder %v171_v30, 0.0  ;;  %v175_v32 = vmul.f32 0.33, %v171_v30 }
 0x132   :  { %v178_v33 = vsel %vm174_vm0, %v172_v28, %v176_v31 }
 0x133   :  { %v177_v34 = vsel %vm173_vm1, %v171_v30, %v175_v32  ;;  %180 = vst [vmem:[#allocation9 + $0x8] sm:$0xff] %v178_v33 }
 0x134   :  { %179 = vst [vmem:[#allocation9] sm:$0xff] %v177_v34 }
 0x135   :  { %368 = shalt.err (!%p365_p0)
}
 0x136   :  { %s369_s28 = scalar_lea.hbm %s478_s3, 256 }
 0x137   :  { %p370_p1 = scmp.ne.s32.totalorder %s478_s3, %s369_s28  ;;  %p373_p2 = scmp.lt.u32.totalorder %s369_s28, %s478_s3 }
 0x139   :  { %p375_p3 = pnand %p373_p2, %p370_p1 }
 0x13b   :  { %378 = shalt.err (!%p375_p3)
}
 0x13c   :  { %192 = dma.vmem_to_hbm [thread:$0]  %s187_s22, 256, %s478_s3, [#allocation5], %s387_s24, %s387_s24, %s388_s25  }
 0x13d   :  { %383 = dma.done.wait [#allocation5], 256  }
 0x13e   :  { %384 = vsyncadd [#allocation5], 4294967040 }
 0x13f   :  { %196 = vsyncpa [#allocation4], 1 }
 0x140   :  { %197 = vsyncpa [#allocation7], 1 }
 0x141   :  { %198 = vsyncpa [#allocation5], 1 }

</bundles_post_ra>
